<compile_context>
chip_gen: v7x
topology: tpu7x:2x2x1
jax: 0.10.0
libtpu: 0.0.40
codegen_flags: <defaults>
</compile_context>

<pallas_src>
import functools

import jax
import jax.numpy as jnp
from jax.experimental import pallas as pl
from jax.experimental.pallas import tpu as pltpu

HIDDEN = 256
DROP_P = 0.5
LANE = 128


def _round_up(n, m):
    return (n + m - 1) // m * m


def _hash_u32(x):
    # lowbias32 integer hash; uint32 arithmetic wraps (desired).
    x = x ^ (x >> jnp.uint32(16))
    x = x * jnp.uint32(0x7FEB352D)
    x = x ^ (x >> jnp.uint32(15))
    x = x * jnp.uint32(0x846CA68B)
    x = x ^ (x >> jnp.uint32(16))
    return x


def _dropout_net_kernel(seed_ref, x_ref, w1_ref, b1_ref, w2_ref, b2_ref, o_ref):
    tile_b = x_ref.shape[0]
    h_dim = w1_ref.shape[1]

    # fc1 (bf16 MXU inputs, f32 accumulate) + bias + ReLU
    h = jnp.dot(x_ref[...].astype(jnp.bfloat16), w1_ref[...],
                preferred_element_type=jnp.float32)
    h = h + b1_ref[...]                       # (TB, H) + (1, H)
    h = jnp.maximum(h, 0.0)

    # Dropout p=0.5: counter-based hash PRNG, one uint32 per element.
    # Counter uses the GLOBAL row index so every batch tile gets a distinct mask.
    row = jax.lax.broadcasted_iota(jnp.int32, (tile_b, h_dim), 0).astype(jnp.uint32)
    col = jax.lax.broadcasted_iota(jnp.int32, (tile_b, h_dim), 1).astype(jnp.uint32)
    grow = row + pl.program_id(0).astype(jnp.uint32) * jnp.uint32(tile_b)
    ctr = grow * jnp.uint32(h_dim) + col
    seed = seed_ref[0].astype(jnp.uint32)
    bits = _hash_u32(ctr + seed * jnp.uint32(0x9E3779B9))
    # keep with probability (1 - p) = 0.5 ; fold 1/(1-p) scale into the select.
    keep = bits >= jnp.uint32(0x80000000)
    h = jnp.where(keep, h * jnp.float32(1.0 / (1.0 - DROP_P)), jnp.float32(0.0))

    # fc2 (bf16 MXU inputs, f32 accumulate) + bias; lane-dense padded output.
    out = jnp.dot(h.astype(jnp.bfloat16), w2_ref[...],
                  preferred_element_type=jnp.float32)
    o_ref[...] = out + b2_ref[...]            # (TB, Lp) + (1, Lp)


@jax.jit
def dropout_net_forward(x, w1, b1, w2, b2, seed):
    """x: (B, F) f32, w1: (F, 256), b1: (256,), w2: (256, L), b2: (L,), seed: int32."""
    B, F = x.shape
    H = w1.shape[1]
    L = w2.shape[1]

    L_pad = _round_up(L, LANE)                 # lane-dense fc2 output
    tile_b = min(512, _round_up(B, 8))         # batch tile (sweepable)
    B_pad = _round_up(B, tile_b)

    x_p = x if B_pad == B else jnp.pad(x, ((0, B_pad - B), (0, 0)))
    w1_bf = w1.astype(jnp.bfloat16)
    w2_bf = jnp.pad(w2, ((0, 0), (0, L_pad - L))).astype(jnp.bfloat16)
    b1_2d = b1.reshape(1, H).astype(jnp.float32)
    b2_2d = jnp.pad(b2, (0, L_pad - L)).reshape(1, L_pad).astype(jnp.float32)
    seed_arr = jnp.asarray([seed], dtype=jnp.int32)

    grid = (B_pad // tile_b,)

    out = pl.pallas_call(
        _dropout_net_kernel,
        out_shape=jax.ShapeDtypeStruct((B_pad, L_pad), jnp.float32),
        grid_spec=pltpu.PrefetchScalarGridSpec(
            num_scalar_prefetch=1,
            grid=grid,
            in_specs=[
                pl.BlockSpec((tile_b, F), lambda i, seed: (i, 0)),   # x: streamed
                pl.BlockSpec((F, H),      lambda i, seed: (0, 0)),   # w1: resident
                pl.BlockSpec((1, H),      lambda i, seed: (0, 0)),   # b1: resident
                pl.BlockSpec((H, L_pad),  lambda i, seed: (0, 0)),   # w2: resident
                pl.BlockSpec((1, L_pad),  lambda i, seed: (0, 0)),   # b2: resident
            ],
            out_specs=pl.BlockSpec((tile_b, L_pad), lambda i, seed: (i, 0)),
        ),
        compiler_params=pltpu.CompilerParams(
            dimension_semantics=("parallel",),
            vmem_limit_bytes=32 * 1024 * 1024,
        ),
        cost_estimate=pl.CostEstimate(
            flops=2 * B_pad * (F * H + H * L_pad),
            transcendentals=0,
            bytes_accessed=4 * B_pad * (F + L_pad)
            + 2 * (F * H + H * L_pad)
            + 4 * (H + L_pad),
        ),
    )(seed_arr, x_p, w1_bf, b1_2d, w2_bf, b2_2d)

    return out[:B, :L]


if __name__ == "__main__":
    # Small shapes consistent with the module: feature_num=32, label_num=16, batch=8.
    B, FEATURE_NUM, LABEL_NUM = 8, 32, 16

    key = jax.random.PRNGKey(0)
    kx, kw1, kb1, kw2, kb2 = jax.random.split(key, 5)

    x = jax.random.normal(kx, (B, FEATURE_NUM), dtype=jnp.float32)
    # Deterministic synthetic parameters (nn.Linear-like uniform init, transposed for the kernel).
    lim1 = 1.0 / jnp.sqrt(FEATURE_NUM)
    w1 = jax.random.uniform(kw1, (FEATURE_NUM, HIDDEN), jnp.float32, -lim1, lim1)
    b1 = jax.random.uniform(kb1, (HIDDEN,), jnp.float32, -lim1, lim1)
    lim2 = 1.0 / jnp.sqrt(HIDDEN)
    w2 = jax.random.uniform(kw2, (HIDDEN, LABEL_NUM), jnp.float32, -lim2, lim2)
    b2 = jax.random.uniform(kb2, (LABEL_NUM,), jnp.float32, -lim2, lim2)

    out = dropout_net_forward(x, w1, b1, w2, b2, jnp.int32(1234))
    jax.block_until_ready(out)
    assert out.shape == (B, LABEL_NUM) and out.dtype == jnp.float32
    assert bool(jnp.all(jnp.isfinite(out)))
    print("KERNEL_OK")
</pallas_src>

<mosaic_0001>
module attributes {stable_mosaic.version = 11 : i64} {
  func.func @_dropout_net_kernel(%arg0: i32, %arg1: memref<1xi32, #tpu.memory_space<smem>>, %arg2: memref<8x32xf32, #tpu.memory_space<vmem>>, %arg3: memref<32x256xbf16, #tpu.memory_space<vmem>>, %arg4: memref<1x256xf32, #tpu.memory_space<vmem>>, %arg5: memref<256x128xbf16, #tpu.memory_space<vmem>>, %arg6: memref<1x128xf32, #tpu.memory_space<vmem>>, %arg7: memref<8x128xf32, #tpu.memory_space<vmem>>) attributes {dimension_semantics = [#tpu.dimension_semantics<parallel>], iteration_bounds = array<i64: 1>, scalar_prefetch = 1 : i64, scratch_operands = 0 : i64, tpu.core_type = #tpu.core_type<tc>, window_params = [{transform_indices = @transform_0, window_bounds = array<i64: 8, 32>}, {pipeline_mode = #tpu.pipeline_mode<synchronous>, transform_indices = @transform_1, window_bounds = array<i64: 32, 256>}, {pipeline_mode = #tpu.pipeline_mode<synchronous>, transform_indices = @transform_2, window_bounds = array<i64: 1, 256>}, {pipeline_mode = #tpu.pipeline_mode<synchronous>, transform_indices = @transform_3, window_bounds = array<i64: 256, 128>}, {pipeline_mode = #tpu.pipeline_mode<synchronous>, transform_indices = @transform_4, window_bounds = array<i64: 1, 128>}, {transform_indices = @transform_5, window_bounds = array<i64: 8, 128>}]} {
    %c0 = arith.constant 0 : index
    %c0_0 = arith.constant 0 : index
    %0 = vector.load %arg2[%c0, %c0_0] : memref<8x32xf32, #tpu.memory_space<vmem>>, vector<8x32xf32>
    %1 = arith.truncf %0 : vector<8x32xf32> to vector<8x32xbf16>
    %c0_1 = arith.constant 0 : index
    %c0_2 = arith.constant 0 : index
    %2 = vector.load %arg3[%c0_1, %c0_2] : memref<32x256xbf16, #tpu.memory_space<vmem>>, vector<32x256xbf16>
    %cst = arith.constant dense<0.000000e+00> : vector<8x256xf32>
    %3 = tpu.matmul %1, %2, %cst {dimension_numbers = #tpu.dot_dimension_numbers<[1], [0], [0], [1], [0, 0, 1, 1], [], []>} : vector<8x32xbf16>, vector<32x256xbf16>, vector<8x256xf32> -> vector<8x256xf32>
    %c0_3 = arith.constant 0 : index
    %c0_4 = arith.constant 0 : index
    %4 = vector.load %arg4[%c0_3, %c0_4] : memref<1x256xf32, #tpu.memory_space<vmem>>, vector<1x256xf32>
    %5 = vector.broadcast %4 : vector<1x256xf32> to vector<8x256xf32>
    %6 = arith.addf %3, %5 : vector<8x256xf32>
    %cst_5 = arith.constant 0.000000e+00 : f32
    %7 = vector.broadcast %cst_5 : f32 to vector<8x256xf32>
    %8 = arith.maximumf %6, %7 : vector<8x256xf32>
    %9 = tpu.iota {dimensions = array<i32: 0>} : vector<8x256xi32>
    %10 = tpu.iota {dimensions = array<i32: 1>} : vector<8x256xi32>
    %c8_i32 = arith.constant 8 : i32
    %11 = arith.muli %arg0, %c8_i32 : i32
    %12 = vector.broadcast %11 : i32 to vector<8x256xi32>
    %13 = arith.addi %9, %12 : vector<8x256xi32>
    %c256_i32 = arith.constant 256 : i32
    %14 = vector.broadcast %c256_i32 : i32 to vector<8x256xi32>
    %15 = arith.muli %13, %14 : vector<8x256xi32>
    %16 = arith.addi %15, %10 : vector<8x256xi32>
    %c0_6 = arith.constant 0 : index
    %17 = memref.load %arg1[%c0_6] : memref<1xi32, #tpu.memory_space<smem>>
    %c-1640531527_i32 = arith.constant -1640531527 : i32
    %18 = arith.muli %17, %c-1640531527_i32 : i32
    %19 = vector.broadcast %18 : i32 to vector<8x256xi32>
    %20 = arith.addi %16, %19 : vector<8x256xi32>
    %c16_i32 = arith.constant 16 : i32
    %21 = vector.broadcast %c16_i32 : i32 to vector<8x256xi32>
    %22 = arith.shrui %20, %21 : vector<8x256xi32>
    %23 = arith.xori %20, %22 : vector<8x256xi32>
    %c2146121005_i32 = arith.constant 2146121005 : i32
    %24 = vector.broadcast %c2146121005_i32 : i32 to vector<8x256xi32>
    %25 = arith.muli %23, %24 : vector<8x256xi32>
    %c15_i32 = arith.constant 15 : i32
    %26 = vector.broadcast %c15_i32 : i32 to vector<8x256xi32>
    %27 = arith.shrui %25, %26 : vector<8x256xi32>
    %28 = arith.xori %25, %27 : vector<8x256xi32>
    %c-2073254261_i32 = arith.constant -2073254261 : i32
    %29 = vector.broadcast %c-2073254261_i32 : i32 to vector<8x256xi32>
    %30 = arith.muli %28, %29 : vector<8x256xi32>
    %c16_i32_7 = arith.constant 16 : i32
    %31 = vector.broadcast %c16_i32_7 : i32 to vector<8x256xi32>
    %32 = arith.shrui %30, %31 : vector<8x256xi32>
    %33 = arith.xori %30, %32 : vector<8x256xi32>
    %c-2147483648_i32 = arith.constant -2147483648 : i32
    %34 = vector.broadcast %c-2147483648_i32 : i32 to vector<8x256xi32>
    %35 = arith.cmpi uge, %33, %34 : vector<8x256xi32>
    %cst_8 = arith.constant 2.000000e+00 : f32
    %36 = vector.broadcast %cst_8 : f32 to vector<8x256xf32>
    %37 = arith.mulf %8, %36 : vector<8x256xf32>
    %cst_9 = arith.constant 0.000000e+00 : f32
    %38 = vector.broadcast %cst_9 : f32 to vector<8x256xf32>
    %39 = arith.select %35, %37, %38 : vector<8x256xi1>, vector<8x256xf32>
    %40 = arith.truncf %39 : vector<8x256xf32> to vector<8x256xbf16>
    %c0_10 = arith.constant 0 : index
    %c0_11 = arith.constant 0 : index
    %41 = vector.load %arg5[%c0_10, %c0_11] : memref<256x128xbf16, #tpu.memory_space<vmem>>, vector<256x128xbf16>
    %cst_12 = arith.constant dense<0.000000e+00> : vector<8x128xf32>
    %42 = tpu.matmul %40, %41, %cst_12 {dimension_numbers = #tpu.dot_dimension_numbers<[1], [0], [0], [1], [0, 0, 1, 1], [], []>} : vector<8x256xbf16>, vector<256x128xbf16>, vector<8x128xf32> -> vector<8x128xf32>
    %c0_13 = arith.constant 0 : index
    %c0_14 = arith.constant 0 : index
    %43 = vector.load %arg6[%c0_13, %c0_14] : memref<1x128xf32, #tpu.memory_space<vmem>>, vector<1x128xf32>
    %44 = vector.broadcast %43 : vector<1x128xf32> to vector<8x128xf32>
    %45 = arith.addf %42, %44 : vector<8x128xf32>
    %c0_15 = arith.constant 0 : index
    %c0_16 = arith.constant 0 : index
    %46 = vector.load %arg7[%c0_15, %c0_16] : memref<8x128xf32, #tpu.memory_space<vmem>>, vector<8x128xf32>
    tpu.vector_store %arg7[%c0_15, %c0_16], %45 {strides = array<i32>} : memref<8x128xf32, #tpu.memory_space<vmem>>, vector<8x128xf32>,
    return
  }
  func.func @transform_0(%arg0: i32, %arg1: memref<1xi32, #tpu.memory_space<smem>>) -> (i32, i32) {
    %c0_i32 = arith.constant 0 : i32
    %c0_i32_0 = arith.constant 0 : i32
    return %arg0, %c0_i32 : i32, i32
  }
  func.func @transform_1(%arg0: i32, %arg1: memref<1xi32, #tpu.memory_space<smem>>) -> (i32, i32) {
    %c0_i32 = arith.constant 0 : i32
    %c0_i32_0 = arith.constant 0 : i32
    %c0_i32_1 = arith.constant 0 : i32
    return %c0_i32, %c0_i32_0 : i32, i32
  }
  func.func @transform_2(%arg0: i32, %arg1: memref<1xi32, #tpu.memory_space<smem>>) -> (i32, i32) {
    %c0_i32 = arith.constant 0 : i32
    %c0_i32_0 = arith.constant 0 : i32
    %c0_i32_1 = arith.constant 0 : i32
    return %c0_i32, %c0_i32_0 : i32, i32
  }
  func.func @transform_3(%arg0: i32, %arg1: memref<1xi32, #tpu.memory_space<smem>>) -> (i32, i32) {
    %c0_i32 = arith.constant 0 : i32
    %c0_i32_0 = arith.constant 0 : i32
    %c0_i32_1 = arith.constant 0 : i32
    return %c0_i32, %c0_i32_0 : i32, i32
  }
  func.func @transform_4(%arg0: i32, %arg1: memref<1xi32, #tpu.memory_space<smem>>) -> (i32, i32) {
    %c0_i32 = arith.constant 0 : i32
    %c0_i32_0 = arith.constant 0 : i32
    %c0_i32_1 = arith.constant 0 : i32
    return %c0_i32, %c0_i32_0 : i32, i32
  }
  func.func @transform_5(%arg0: i32, %arg1: memref<1xi32, #tpu.memory_space<smem>>) -> (i32, i32) {
    %c0_i32 = arith.constant 0 : i32
    %c0_i32_0 = arith.constant 0 : i32
    return %arg0, %c0_i32 : i32, i32
  }
}

</mosaic_0001>

<bundles_post_ra>
// kernel: dropout_net_forward.1
= control target key start
LH: loop header
LB: loop body
LE: loop exit
PB: predicated region body
PF: predicated region fallthrough
CT: control target
= control target key end

     0   :  { %v437_v2 = vmov 0   ;;  %vm62_vm0 = vcmask 261120   ;;  %s558_s0 = inlined_call_operand.<no memory space> [shape: s32[1], index: 0, kind: input, shape index: {}]   ;;  %s559_s1 = inlined_call_operand.vmem [shape: f32[8,32], index: 1, kind: input, shape index: {}]   ;;  %s560_s2 = inlined_call_operand.vmem [shape: bf16[32,256], index: 2, kind: input, shape index: {}]   ;;  %s561_s3 = inlined_call_operand.vmem [shape: f32[1,256], index: 3, kind: input, shape index: {}]   ;;  %s562_s4 = inlined_call_operand.vmem [shape: bf16[256,128], index: 4, kind: input, shape index: {}]   ;;  %s563_s5 = inlined_call_operand.vmem [shape: f32[1,128], index: 5, kind: input, shape index: {}]   ;;  %s564_s6 = inlined_call_operand.hbm [shape: f32[8,128], index: 6, kind: output, shape index: {}]  }
   0x1   :  { %v391_v0 = vld [vmem:[%s560_s2 + $0x4] ss:$8 sps:$4 sm:$0xff]   ;;  %v393_v1 = vld [vmem:[%s560_s2] ss:$8 sps:$4 sm:$0xff]   ;;  %98 = vmatprep.mubr.bf16.mxu0 %v437_v2  ;;  %v394_v3 = vld [vmem:[%s560_s2 + $0x14] ss:$8 sps:$4 sm:$0xff]  }
   0x2   :  { %66 = vmatprep.subr.bf16.mxu0 %v391_v0  ;;  %v396_v4 = vld [vmem:[%s560_s2 + $0x10] ss:$8 sps:$4 sm:$0xff]   ;;  %v24_v5 = vld [vmem:[%s559_s1] sm:$0xff]  ;;  %v399_v8 = vld [vmem:[%s562_s4 + $0x48] sm:$0xff]  }
   0x3   :  { %67 = vmatpush1.bf16.msra.mxu0 %v393_v1  ;;  %v397_v6 = vld [vmem:[%s562_s4 + $0x40] sm:$0xff]   ;;  %v25_v9 = vpack.c.bf16 %v24_v5, %v24_v5  ;;  %v400_v10 = vld [vmem:[%s562_s4 + $0x8] sm:$0xff]   ;;  %v401_v11 = vld [vmem:[%s562_s4 + $0x50] sm:$0xff]  }
   0x4   :  { %68 = vmatprep.subr.bf16.mxu0 %v394_v3  ;;  %v398_v7 = vld [vmem:[%s562_s4] sm:$0xff]   ;;  %367 = vmatprep.subr.bf16.mxu1 %v397_v6  ;;  %v402_v12 = vld [vmem:[%s562_s4 + $0x10] sm:$0xff]   ;;  %v403_v13 = vld [vmem:[%s562_s4 + $0x58] sm:$0xff]  }
   0x5   :  { %368 = vmatpush3.bf16.msra.mxu1 %v398_v7  ;;  %v404_v14 = vld [vmem:[%s562_s4 + $0x18] sm:$0xff]   ;;  %v405_v15 = vld [vmem:[%s562_s4 + $0x60] sm:$0xff]  }
   0x6   :  { %369 = vmatprep.subr.bf16.mxu1 %v399_v8 }
   0x7   :  { %69 = vmatpush1.bf16.msra.mxu0 %v396_v4 }
   0x9   :  { %370 = vmatpush3.bf16.msra.mxu1 %v400_v10 }
   0xa   :  { %343 = vmatmul.mubr.msk.bf16.vlgmr.msra.gmra.mrb[0].mxu0 %vm62_vm0, %v25_v9  ;;  %371 = vmatprep.subr.bf16.mxu1 %v401_v11 }
   0xd   :  { %372 = vmatpush3.bf16.msra.mxu1 %v402_v12 }
   0xe   :  { %373 = vmatprep.subr.bf16.mxu1 %v403_v13 }
   0xf   :  { %12 = vsyncpa [#allocation5], 0  ;;  %v406_v16 = vld [vmem:[%s562_s4 + $0x20] sm:$0xff]   ;;  %v407_v17 = vld [vmem:[%s562_s4 + $0x68] sm:$0xff]   ;;  %v32_v23 = vlaneseq  ;;  %s121_s1 = smul.u32 2654435769, %s558_s0 }
  0x10   :  { %v408_v18 = vld [vmem:[%s562_s4 + $0x28] sm:$0xff]   ;;  %v409_v19 = vld [vmem:[%s562_s4 + $0x70] sm:$0xff]   ;;  %v411_v21 = vld [vmem:[%s562_s4 + $0x78] sm:$0xff]   ;;  %s438_s15 = smov [#allocation4]  }
  0x11   :  { %374 = vmatpush3.bf16.msra.mxu1 %v404_v14  ;;  %v410_v20 = vld [vmem:[%s562_s4 + $0x30] sm:$0xff]   ;;  %v412_v22 = vld [vmem:[%s562_s4 + $0x38] sm:$0xff]   ;;  %v33_v24 = vshrl.u32 %v32_v23, 7  ;;  %v112_v25 = vand.u32 127, %v32_v23  ;;  %v122_v30 = vstv %s121_s1  ;;  %v30_v46 = vld [vmem:[%s561_s3] sm:$0x3] }
  0x12   :  { %375 = vmatprep.subr.bf16.mxu1 %v405_v15  ;;  %v344_v4 = vld [vmem:[%s563_s5] ss:$0 sm:$0xff]  ;;  %s331_s16 = sshll.u32 %s438_s15, 4  ;;  %s332_s16 = int_to_ptr.vmem [resolvable:$true] %s331_s16 }
  0x13   :  { %v113_v26 = vadd.s32 128, %v112_v25  ;;  %v117_v27 = vmul.u32 256, %v33_v24  ;;  %v34_v44 = vsub.s32 0, %v33_v24  ;;  %v38_v47 = vsub.s32 1, %v33_v24  ;;  %s413_s17 = scalar_lea.vmem %s332_s16, 128  ;;  %p418_p1 = scmp.lt.s32.totalorder %s332_s16, %s332_s16 }
  0x14   :  { %p414_p0 = scmp.ne.s32.totalorder %s332_s16, %s413_s17  ;;  %p419_p2 = scmp.lt.s32.totalorder %s413_s17, %s413_s17 }
  0x15   :  { %376 = vmatpush3.bf16.msra.mxu1 %v406_v16  ;;  %v119_v28 = vadd.s32 %v117_v27, %v113_v26  ;;  %v118_v29 = vadd.s32 %v117_v27, %v112_v25  ;;  %v35_v49 = vrot.slane %v30_v46, %v34_v44  ;;  %v39_v51 = vrot.slane %v30_v46, %v38_v47 }
  0x16   :  { %377 = vmatprep.subr.bf16.mxu1 %v407_v17  ;;  %p420_p3 = por %p419_p2, %p418_p1 }
  0x17   :  { %v124_v31 = vadd.s32 %v122_v30, %v119_v28  ;;  %v123_v32 = vadd.s32 %v122_v30, %v118_v29 }
  0x18   :  { %p421_p4 = pnand %p420_p3, %p414_p0 }
  0x19   :  { %378 = vmatpush3.bf16.msra.mxu1 %v408_v18  ;;  %v126_v33 = vshrl.u32 %v124_v31, 16  ;;  %v125_v34 = vshrl.u32 %v123_v32, 16 }
  0x1a   :  { %379 = vmatprep.subr.bf16.mxu1 %v409_v19 }
  0x1b   :  { %v128_v35 = vxor.u32 %v126_v33, %v124_v31  ;;  %v127_v36 = vxor.u32 %v125_v34, %v123_v32 }
  0x1d   :  { %380 = vmatpush3.bf16.msra.mxu1 %v410_v20  ;;  %v130_v37 = vmul.u32 2146121005, %v128_v35  ;;  %v129_v38 = vmul.u32 2146121005, %v127_v36 }
  0x1e   :  { %381 = vmatprep.subr.bf16.mxu1 %v411_v21 }
  0x1f   :  { %v132_v39 = vshrl.u32 %v130_v37, 15  ;;  %v131_v40 = vshrl.u32 %v129_v38, 15 }
  0x21   :  { %382 = vmatpush3.bf16.msra.mxu1 %v412_v22  ;;  %v134_v41 = vxor.u32 %v132_v39, %v130_v37  ;;  %v133_v42 = vxor.u32 %v131_v40, %v129_v38 }
  0x23   :  { %v136_v43 = vmul.u32 2221713035, %v134_v41  ;;  %v135_v45 = vmul.u32 2221713035, %v133_v42 }
  0x25   :  { %v138_v48 = vshrl.u32 %v136_v43, 16  ;;  %v137_v50 = vshrl.u32 %v135_v45, 16 }
  0x27   :  { %v140_v53 = vxor.u32 %v138_v48, %v136_v43  ;;  %v139_v56 = vxor.u32 %v137_v50, %v135_v45 }
  0x29   :  { %vm142_vm1 = vcmp.ge.u32.totalorder %v140_v53, 2147483648  ;;  %vm141_vm2 = vcmp.ge.u32.totalorder %v139_v56, 2147483648 }
  0x2a   :  { %vm361_vm3 = vmpackc.low %vm142_vm1, %vm142_vm1 }
  0x2b   :  { %vm364_vm4 = vmpackc.low %vm141_vm2, %vm141_vm2 }
  0xdd   :  { %v100_v52 = vpop.f32.mrb[0].mxu0 }
  0xde   :  { %v101_v54 = vadd.f32 %v100_v52, %v35_v49  ;;  %v102_v55 = vpop.f32.mrb[1].mxu0 }
  0xdf   :  { %v103_v57 = vadd.f32 %v102_v55, %v39_v51  ;;  %v104_v58 = vpop.f32.mrb[2].mxu0 }
  0xe0   :  { %v107_v59 = vmax.f32 %v101_v54, 0.0  ;;  %v105_v60 = vpop.f32.mrb[3].mxu0 }
  0xe1   :  { %v108_v61 = vmax.f32 %v103_v57, 0.0 }
  0xe2   :  { %v143_v62 = vmul.f32 2.0, %v107_v59 }
  0xe3   :  { %v144_v63 = vmul.f32 2.0, %v108_v61 }
  0xe4   :  { %v365_v1 = vpack.c.bf16 %v143_v62, %v143_v62 }
  0xe5   :  { %v362_v0 = vpack.c.bf16 %v144_v63, %v144_v63 }
  0xe7   :  { %363 = vmatprep.mubr.msk.bf16.mxu1 %vm361_vm3, %v362_v0 }
  0xe8   :  { %366 = vmatmul.mubr.msk.bf16.vlgmr.msra.gmra.mrb[0].mxu1 %vm364_vm4, %v365_v1 }
 0x1bb   :  { %v383_v2 = vpop.f32.mrb[0].mxu1 }
 0x1bc   :  { %v384_v3 = vpop.f32.mrb[1].mxu1 }
 0x1bd   :  { %v385_v5 = vadd.f32 %v384_v3, %v383_v2  ;;  %v386_v6 = vpop.f32.mrb[2].mxu1 }
 0x1be   :  { %v387_v7 = vpop.f32.mrb[3].mxu1 }
 0x1bf   :  { %v319_v8 = vadd.f32 %v385_v5, %v344_v4 }
 0x1c1   :  { %324 = vst [vmem:[#allocation4] sm:$0xff] %v319_v8 }
 0x1c2   :  { %424 = shalt.err (!%p421_p4)
}
 0x1c3   :  { %s425_s20 = scalar_lea.hbm %s564_s6, 128 }
 0x1c4   :  { %p426_p5 = scmp.ne.s32.totalorder %s564_s6, %s425_s20  ;;  %p429_p6 = scmp.lt.u32.totalorder %s425_s20, %s564_s6 }
 0x1c6   :  { %p431_p7 = pnand %p429_p6, %p426_p5 }
 0x1c8   :  { %434 = shalt.err (!%p431_p7)
}
 0x1c9   :  { %334 = dma.vmem_to_hbm [thread:$0]  %s332_s16, 128, %s564_s6, [#allocation5]  }
 0x1ca   :  { %435 = dma.done.wait [#allocation5], 128  }
 0x1cb   :  { %436 = vsyncadd [#allocation5], 4294967168 }
 0x1cc   :  { %338 = vsyncpa [#allocation5], 1 }

</bundles_post_ra>
